<compile_context>
chip_gen: v7x
topology: tpu7x:2x2x1
jax: 0.10.0
libtpu: 0.0.40
codegen_flags: <defaults>
</compile_context>

<pallas_src>
import jax
import jax.numpy as jnp
from jax.experimental import pallas as pl
from jax.experimental.pallas import tpu as pltpu

IN_DIM = 50
HID_DIM = 50
OUT_DIM = 5


def _fnn_split5_kernel(x_ref, w1_ref, b1_ref, w2_ref, b2_ref, o_ref):
    # Hidden layer: x @ W1 (MXU, f32 accumulation), + b1, ReLU — all on the
    # current batch tile in VMEM. Bias add / ReLU ride free VPU slots.
    h = jnp.dot(x_ref[...], w1_ref[...], preferred_element_type=jnp.float32)
    h = h + b1_ref[...]                       # b1 is (1, 50) -> broadcasts over batch tile
    h = jnp.maximum(h, 0.0)
    # Output layer: h @ W2 + b2. Cast h to the weight dtype so the bf16 path
    # actually uses the bf16 MXU pipe (no-op for f32).
    out = jnp.dot(h.astype(w2_ref.dtype), w2_ref[...],
                  preferred_element_type=jnp.float32)
    out = out + b2_ref[...]                   # b2 is (1, 5)
    o_ref[...] = out.astype(o_ref.dtype)


def _round_up(v, m):
    return -(-v // m) * m


def fnn_split5(x, w1, b1, w2, b2, *, block_batch=4096, compute_dtype=None):
    """Forward pass of FNNspilt5.

    Args:
      x:  (B, 50)  -- input activations
      w1: (50, 50) -- dense6 weight, transposed to [in, out]
      b1: (50,)    -- dense6 bias
      w2: (50, 5)  -- out weight, transposed to [in, out]
      b2: (5,)     -- out bias
      block_batch: requested batch tile size (rounded to a multiple of 8,
        capped at 8192 and at ceil(B/2) so the grid has >= 2 steps on v7x).
      compute_dtype: optional dtype (e.g. jnp.bfloat16) for x / W on the MXU.
        Accumulation, bias add and ReLU stay in f32.
    Returns:
      (B, 5) array with x's original dtype.
    """
    B = x.shape[0]
    out_dtype = x.dtype

    if compute_dtype is not None:
        x = x.astype(compute_dtype)
        w1 = w1.astype(compute_dtype)
        w2 = w2.astype(compute_dtype)
    # Biases stay f32 (added to the f32 accumulator).
    b1_2d = b1.reshape(1, HID_DIM).astype(jnp.float32)
    b2_2d = b2.reshape(1, OUT_DIM).astype(jnp.float32)

    # ---- Batch tile selection --------------------------------------------
    # Requested tile, rounded up to a sublane multiple of 8.
    req = _round_up(max(8, min(block_batch, B)), 8)
    # Guarantee >= 2 grid steps when the batch allows (v7x megacore sharding).
    half = _round_up(max(8, -(-B // 2)), 8)
    # Hard cap keeps the lane-padded working set well inside every
    # generation's VMEM (see budget below); 8192 rows already hides DMA.
    tb = max(8, min(req, half, 8192))
    grid = (pl.cdiv(B, tb),)

    # ---- VMEM budget (lane-padded) ---------------------------------------
    # x block and out block are each stored as tb x 128 lanes x 4 B in VMEM
    # and double-buffered; plus one tb x 128 x 4 B f32 intermediate `h`:
    #   ~ 5 * tb * 512 B  (+ ~weights/biases, tiny).
    vmem_need = 5 * tb * 512 + (1 << 20)
    vmem_limit = int(min(48 * 1024 * 1024, max(32 * 1024 * 1024, vmem_need)))

    # ---- Cost estimate -----------------------------------------------------
    x_bytes = B * IN_DIM * x.dtype.itemsize
    o_bytes = B * OUT_DIM * jnp.dtype(out_dtype).itemsize
    w_bytes = (w1.size * w1.dtype.itemsize + w2.size * w2.dtype.itemsize
               + b1_2d.size * 4 + b2_2d.size * 4)
    cost = pl.CostEstimate(
        flops=2 * B * (IN_DIM * HID_DIM + HID_DIM * OUT_DIM),
        transcendentals=0,
        bytes_accessed=x_bytes + o_bytes + w_bytes,
    )

    # x / out are tiled along batch; weights & biases stay resident
    # (constant block index across all grid steps).
    x_spec = pl.BlockSpec((tb, IN_DIM), lambda i: (i, 0))
    w1_spec = pl.BlockSpec((IN_DIM, HID_DIM), lambda i: (0, 0))
    b1_spec = pl.BlockSpec((1, HID_DIM), lambda i: (0, 0))
    w2_spec = pl.BlockSpec((HID_DIM, OUT_DIM), lambda i: (0, 0))
    b2_spec = pl.BlockSpec((1, OUT_DIM), lambda i: (0, 0))
    out_spec = pl.BlockSpec((tb, OUT_DIM), lambda i: (i, 0))

    return pl.pallas_call(
        _fnn_split5_kernel,
        out_shape=jax.ShapeDtypeStruct((B, OUT_DIM), out_dtype),
        grid=grid,
        in_specs=[x_spec, w1_spec, b1_spec, w2_spec, b2_spec],
        out_specs=out_spec,
        compiler_params=pltpu.CompilerParams(
            dimension_semantics=("parallel",),
            vmem_limit_bytes=vmem_limit),
        cost_estimate=cost,
    )(x, w1, b1_2d, w2, b2_2d)


def _reference(x, w1, b1, w2, b2):
    h = jnp.maximum(x @ w1 + b1, 0.0)
    return h @ w2 + b2


if __name__ == "__main__":
    key = jax.random.PRNGKey(0)
    k_x, k_w1, k_b1, k_w2, k_b2 = jax.random.split(key, 5)

    # Deterministic parameter init (synthetic; mirrors nn.Linear shapes).
    # dense6: Linear(50, 50) -> weight (50, 50), bias (50,)
    # out:    Linear(50, 5)  -> weight (5, 50),  bias (5,)
    # We store the transposed [in, out] form for the kernel.
    w1 = jax.random.uniform(k_w1, (IN_DIM, HID_DIM), dtype=jnp.float32,
                            minval=-0.1414, maxval=0.1414)   # ~1/sqrt(50)
    b1 = jax.random.uniform(k_b1, (HID_DIM,), dtype=jnp.float32,
                            minval=-0.1414, maxval=0.1414)
    w2 = jax.random.uniform(k_w2, (HID_DIM, OUT_DIM), dtype=jnp.float32,
                            minval=-0.1414, maxval=0.1414)
    b2 = jax.random.uniform(k_b2, (OUT_DIM,), dtype=jnp.float32,
                            minval=-0.1414, maxval=0.1414)

    # Small batch self-test (single tile).
    B = 8
    x = jax.random.normal(k_x, (B, IN_DIM), dtype=jnp.float32)
    out = fnn_split5(x, w1, b1, w2, b2)
    jax.block_until_ready(out)
    ref = _reference(x, w1, b1, w2, b2)
    assert out.shape == (B, OUT_DIM)
    assert jnp.allclose(out, ref, atol=1e-5, rtol=1e-5), "mismatch vs reference"

    # Ragged batch, multiple grid steps (exercises the partial-tile path and
    # the >=2-step guarantee).
    B2 = 1037
    x2 = jax.random.normal(k_x, (B2, IN_DIM), dtype=jnp.float32)
    out2 = fnn_split5(x2, w1, b1, w2, b2, block_batch=4096)
    jax.block_until_ready(out2)
    ref2 = _reference(x2, w1, b1, w2, b2)
    assert out2.shape == (B2, OUT_DIM)
    assert jnp.allclose(out2, ref2, atol=1e-5, rtol=1e-5), \
        "mismatch vs reference (ragged batch)"

    # Optional bf16 compute path (looser tolerance vs the f32 reference).
    out_bf16 = fnn_split5(x, w1, b1, w2, b2, compute_dtype=jnp.bfloat16)
    jax.block_until_ready(out_bf16)
    assert out_bf16.shape == (B, OUT_DIM)
    assert jnp.allclose(out_bf16, ref, atol=5e-2, rtol=5e-2), \
        "mismatch vs reference (bf16 compute)"

    print("KERNEL_OK")
</pallas_src>

<mosaic_0001>
module attributes {stable_mosaic.version = 11 : i64} {
  func.func @_fnn_split5_kernel(%arg0: i32, %arg1: memref<8x50xf32, #tpu.memory_space<vmem>>, %arg2: memref<50x50xf32, #tpu.memory_space<vmem>>, %arg3: memref<1x50xf32, #tpu.memory_space<vmem>>, %arg4: memref<50x5xf32, #tpu.memory_space<vmem>>, %arg5: memref<1x5xf32, #tpu.memory_space<vmem>>, %arg6: memref<8x5xf32, #tpu.memory_space<vmem>>) attributes {dimension_semantics = [#tpu.dimension_semantics<parallel>], iteration_bounds = array<i64: 1>, scalar_prefetch = 0 : i64, scratch_operands = 0 : i64, tpu.core_type = #tpu.core_type<tc>, window_params = [{transform_indices = @transform_0, window_bounds = array<i64: 8, 50>}, {pipeline_mode = #tpu.pipeline_mode<synchronous>, transform_indices = @transform_1, window_bounds = array<i64: 50, 50>}, {pipeline_mode = #tpu.pipeline_mode<synchronous>, transform_indices = @transform_2, window_bounds = array<i64: 1, 50>}, {pipeline_mode = #tpu.pipeline_mode<synchronous>, transform_indices = @transform_3, window_bounds = array<i64: 50, 5>}, {pipeline_mode = #tpu.pipeline_mode<synchronous>, transform_indices = @transform_4, window_bounds = array<i64: 1, 5>}, {transform_indices = @transform_5, window_bounds = array<i64: 8, 5>}]} {
    %c0 = arith.constant 0 : index
    %c0_0 = arith.constant 0 : index
    %0 = vector.load %arg1[%c0, %c0_0] : memref<8x50xf32, #tpu.memory_space<vmem>>, vector<8x50xf32>
    %c0_1 = arith.constant 0 : index
    %c0_2 = arith.constant 0 : index
    %1 = vector.load %arg2[%c0_1, %c0_2] : memref<50x50xf32, #tpu.memory_space<vmem>>, vector<50x50xf32>
    %cst = arith.constant dense<0.000000e+00> : vector<8x50xf32>
    %2 = tpu.matmul %0, %1, %cst {dimension_numbers = #tpu.dot_dimension_numbers<[1], [0], [0], [1], [0, 0, 1, 1], [], []>} : vector<8x50xf32>, vector<50x50xf32>, vector<8x50xf32> -> vector<8x50xf32>
    %c0_3 = arith.constant 0 : index
    %c0_4 = arith.constant 0 : index
    %3 = vector.load %arg3[%c0_3, %c0_4] : memref<1x50xf32, #tpu.memory_space<vmem>>, vector<1x50xf32>
    %4 = vector.broadcast %3 : vector<1x50xf32> to vector<8x50xf32>
    %5 = arith.addf %2, %4 : vector<8x50xf32>
    %cst_5 = arith.constant 0.000000e+00 : f32
    %6 = vector.broadcast %cst_5 : f32 to vector<8x50xf32>
    %7 = arith.maximumf %5, %6 : vector<8x50xf32>
    %c0_6 = arith.constant 0 : index
    %c0_7 = arith.constant 0 : index
    %8 = vector.load %arg4[%c0_6, %c0_7] : memref<50x5xf32, #tpu.memory_space<vmem>>, vector<50x5xf32>
    %cst_8 = arith.constant dense<0.000000e+00> : vector<8x5xf32>
    %9 = tpu.matmul %7, %8, %cst_8 {dimension_numbers = #tpu.dot_dimension_numbers<[1], [0], [0], [1], [0, 0, 1, 1], [], []>} : vector<8x50xf32>, vector<50x5xf32>, vector<8x5xf32> -> vector<8x5xf32>
    %c0_9 = arith.constant 0 : index
    %c0_10 = arith.constant 0 : index
    %10 = vector.load %arg5[%c0_9, %c0_10] : memref<1x5xf32, #tpu.memory_space<vmem>>, vector<1x5xf32>
    %11 = vector.broadcast %10 : vector<1x5xf32> to vector<8x5xf32>
    %12 = arith.addf %9, %11 : vector<8x5xf32>
    %c0_11 = arith.constant 0 : index
    %c0_12 = arith.constant 0 : index
    %13 = vector.load %arg6[%c0_11, %c0_12] : memref<8x5xf32, #tpu.memory_space<vmem>>, vector<8x5xf32>
    tpu.vector_store %arg6[%c0_11, %c0_12], %12 {strides = array<i32>} : memref<8x5xf32, #tpu.memory_space<vmem>>, vector<8x5xf32>,
    return
  }
  func.func @transform_0(%arg0: i32) -> (i32, i32) {
    %c0_i32 = arith.constant 0 : i32
    %c0_i32_0 = arith.constant 0 : i32
    return %arg0, %c0_i32 : i32, i32
  }
  func.func @transform_1(%arg0: i32) -> (i32, i32) {
    %c0_i32 = arith.constant 0 : i32
    %c0_i32_0 = arith.constant 0 : i32
    %c0_i32_1 = arith.constant 0 : i32
    return %c0_i32, %c0_i32_0 : i32, i32
  }
  func.func @transform_2(%arg0: i32) -> (i32, i32) {
    %c0_i32 = arith.constant 0 : i32
    %c0_i32_0 = arith.constant 0 : i32
    %c0_i32_1 = arith.constant 0 : i32
    return %c0_i32, %c0_i32_0 : i32, i32
  }
  func.func @transform_3(%arg0: i32) -> (i32, i32) {
    %c0_i32 = arith.constant 0 : i32
    %c0_i32_0 = arith.constant 0 : i32
    %c0_i32_1 = arith.constant 0 : i32
    return %c0_i32, %c0_i32_0 : i32, i32
  }
  func.func @transform_4(%arg0: i32) -> (i32, i32) {
    %c0_i32 = arith.constant 0 : i32
    %c0_i32_0 = arith.constant 0 : i32
    %c0_i32_1 = arith.constant 0 : i32
    return %c0_i32, %c0_i32_0 : i32, i32
  }
  func.func @transform_5(%arg0: i32) -> (i32, i32) {
    %c0_i32 = arith.constant 0 : i32
    %c0_i32_0 = arith.constant 0 : i32
    return %arg0, %c0_i32 : i32, i32
  }
}

</mosaic_0001>

<bundles_post_ra>
// kernel: tpu_custom_call.1
= control target key start
LH: loop header
LB: loop body
LE: loop exit
PB: predicated region body
PF: predicated region fallthrough
CT: control target
= control target key end

     0   :  { %v323_v3 = vmov 0.0|0.0   ;;  %vm324_vm0 = vmmov 0   ;;  %v325_v6 = vmov 0.0   ;;  %s420_s0 = inlined_call_operand.vmem [shape: f32[8,50], index: 0, kind: input, shape index: {}]   ;;  %s421_s1 = inlined_call_operand.vmem [shape: f32[50,50], index: 1, kind: input, shape index: {}]   ;;  %s422_s2 = inlined_call_operand.vmem [shape: f32[1,50], index: 2, kind: input, shape index: {}]   ;;  %s423_s3 = inlined_call_operand.vmem [shape: f32[50,5], index: 3, kind: input, shape index: {}]   ;;  %s424_s4 = inlined_call_operand.vmem [shape: f32[1,5], index: 4, kind: input, shape index: {}]   ;;  %s425_s5 = inlined_call_operand.hbm [shape: f32[8,5], index: 5, kind: output, shape index: {}]  }
   0x1   :  { %v22_v0 = vld [vmem:[%s421_s1] sm:$0xff]  ;;  %v23_v1 = vld [vmem:[%s421_s1 + $0x8] sm:$0xff]  ;;  %v24_v2 = vld [vmem:[%s421_s1 + $0x10] sm:$0xff]  ;;  %277 = vmatprep.subr.bf16.mxu0 %v323_v3  ;;  %286 = vmatprep.subr.bf16.mxu1 %v323_v3 }
   0x2   :  { %v278_v4 = vpack.c.bf16 %v23_v1, %v22_v0  ;;  %v25_v5 = vld [vmem:[%s421_s1 + $0x18] sm:$0xff]  ;;  %257 = vmatprep.mubr.msk.f32.mxu0 %vm324_vm0, %v325_v6  ;;  %v115_v7 = vld [vmem:[%s423_s3] sm:$0xff]  ;;  %274 = vmatprep.mubr.msk.f32.mxu1 %vm324_vm0, %v325_v6  ;;  %v116_v9 = vld [vmem:[%s423_s3 + $0x8] sm:$0xff] }
   0x3   :  { %v281_v8 = vpack.c.bf16 %v25_v5, %v24_v2  ;;  %v117_v10 = vld [vmem:[%s423_s3 + $0x10] sm:$0xff]  ;;  %v118_v11 = vld [vmem:[%s423_s3 + $0x18] sm:$0xff]  ;;  %v26_v12 = vld [vmem:[%s421_s1 + $0x20] sm:$0xff]  ;;  %v287_v14 = vpack.c.bf16 %v116_v9, %v115_v7 }
   0x4   :  { %279 = vmatpush3.bf16.msra.mxu0 %v278_v4  ;;  %v27_v13 = vld [vmem:[%s421_s1 + $0x28] sm:$0xff] }
   0x5   :  { %280 = vmatprep.subr.bf16.mxu0 %v323_v3 }
   0x6   :  { %10 = vsyncpa [#allocation3], 0  ;;  %288 = vmatpush3.bf16.msra.mxu1 %v287_v14  ;;  %v290_v15 = vpack.c.bf16 %v118_v11, %v117_v10  ;;  %v284_v16 = vpack.c.bf16 %v27_v13, %v26_v12  ;;  %v28_v17 = vld [vmem:[%s421_s1 + $0x30] sm:$0x3]  ;;  %vm40_vm1 = vcmask 1041408   ;;  %v21_v18 = vld [vmem:[%s420_s0] sm:$0xff] }
   0x7   :  { %289 = vmatprep.subr.bf16.mxu1 %v323_v3  ;;  %vm36_vm2 = vcmask 408576   ;;  %v119_v19 = vld [vmem:[%s423_s3 + $0x20] sm:$0xff]  ;;  %v120_v20 = vld [vmem:[%s423_s3 + $0x28] sm:$0xff]  ;;  %v121_v22 = vld [vmem:[%s423_s3 + $0x30] sm:$0x3]  ;;  %s326_s25 = smov [#allocation2]  }
   0x8   :  { %282 = vmatpush3.bf16.msra.mxu0 %v281_v8  ;;  %v293_v21 = vpack.c.bf16 %v120_v20, %v119_v19  ;;  %v221_v23 = vld [vmem:[%s422_s2] ss:$0 sm:$0xff]  ;;  %s213_s26 = sshll.u32 %s326_s25, 4  ;;  %vm205_vm3 = vcmask 39936   ;;  %s214_s26 = int_to_ptr.vmem [resolvable:$true] %s213_s26 }
   0x9   :  { %283 = vmatprep.subr.bf16.mxu0 %v323_v3  ;;  %v224_v28 = vld [vmem:[%s424_s4] ss:$0 sm:$0xff]  ;;  %s299_s3 = scalar_lea.vmem %s214_s26, 128  ;;  %p304_p1 = scmp.lt.s32.totalorder %s214_s26, %s214_s26 }
   0xa   :  { %291 = vmatpush3.bf16.msra.mxu1 %v290_v15  ;;  %p300_p0 = scmp.ne.s32.totalorder %s214_s26, %s299_s3  ;;  %p305_p2 = scmp.lt.s32.totalorder %s299_s3, %s299_s3 }
   0xb   :  { %292 = vmatprep.subr.bf16.mxu1 %v323_v3 }
   0xc   :  { %285 = vmatpush3.bf16.msra.mxu0 %v284_v16  ;;  %p306_p3 = por %p305_p2, %p304_p1 }
   0xd   :  { %255 = vmatprep.subr.mxu0 %v325_v6 }
   0xe   :  { %294 = vmatpush3.bf16.msra.mxu1 %v293_v21  ;;  %p307_p4 = pnand %p306_p3, %p300_p0 }
   0xf   :  { %272 = vmatprep.subr.mxu1 %v325_v6 }
  0x10   :  { %256 = vmatpush3.msk.msra.mxu0 %vm40_vm1, %v28_v17 }
  0x11   :  { %258 = vmatmul.mubr.msk.f32.vlgmr.msra.gmra.mrb[0].mxu0 %vm36_vm2, %v21_v18 }
  0x12   :  { %273 = vmatpush3.msk.msra.mxu1 %vm40_vm1, %v121_v22 }
  0xe4   :  { %v110_v24 = vpop.f32.mrb[0].mxu0 }
  0xe5   :  { %v111_v25 = vadd.f32 %v221_v23, %v110_v24  ;;  %v259_v26 = vpop.f32.mrb[1].mxu0 }
  0xe7   :  { %v114_v27 = vmax.f32 %v111_v25, 0.0 }
  0xe9   :  { %275 = vmatmul.mubr.msk.f32.vlgmr.msra.gmra.mrb[0].mxu1 %vm36_vm2, %v114_v27 }
 0x1bc   :  { %v201_v29 = vpop.f32.mrb[0].mxu1 }
 0x1bd   :  { %v202_v30 = vadd.f32 %v224_v28, %v201_v29  ;;  %v276_v31 = vpop.f32.mrb[1].mxu1 }
 0x1bf   :  { %206 = vst.msk [vmem:[#allocation2] sm:$0xff] %vm205_vm3, %v202_v30 }
 0x1c0   :  { %310 = shalt.err (!%p307_p4)
}
 0x1c1   :  { %s311_s28 = scalar_lea.hbm %s425_s5, 128 }
 0x1c2   :  { %p312_p5 = scmp.ne.s32.totalorder %s425_s5, %s311_s28  ;;  %p315_p6 = scmp.lt.u32.totalorder %s311_s28, %s425_s5 }
 0x1c4   :  { %p317_p7 = pnand %p315_p6, %p312_p5 }
 0x1c6   :  { %320 = shalt.err (!%p317_p7)
}
 0x1c7   :  { %216 = dma.vmem_to_hbm [thread:$0]  %s214_s26, 128, %s425_s5, [#allocation3]  }
 0x1c8   :  { %321 = dma.done.wait [#allocation3], 128  }
 0x1c9   :  { %322 = vsyncadd [#allocation3], 4294967168 }
 0x1ca   :  { %220 = vsyncpa [#allocation3], 1 }

</bundles_post_ra>
